<compile_context>
chip_gen: v5e
topology: v5e:2x2
jax: 0.10.0
libtpu: 0.0.40
codegen_flags: <defaults>
</compile_context>

<pallas_src>
import functools

import jax
import jax.numpy as jnp
from jax.experimental import pallas as pl
from jax.experimental.pallas import tpu as pltpu


def gcmc_kernel(n_rating,
                user_emb_ref, item_emb_ref,
                edge_iu_ref, edge_ui_ref,
                uhw_ref, ihw_ref,
                bgu_ref, bgi_ref,
                wfu_ref, bfu_ref, wfi_ref, bfi_ref,
                wl1_ref, bl1_ref, wl2_ref, bl2_ref, wl3_ref, bl3_ref,
                out_ref):
    f32 = jnp.float32
    R = n_rating
    TB = user_emb_ref.shape[0]
    n_user = edge_iu_ref.shape[2]
    n_item = edge_ui_ref.shape[2]

    # int8 0/1 edges -> bf16 right at the MXU dot.  No f32 copy of the edge
    # tile is ever written; accumulation stays f32 via preferred_element_type.
    # TB is 32-aligned, so the (R, TB, n) -> (R*TB, n) collapse is
    # layout-preserving (no relayout).
    edge_iu = edge_iu_ref[...].astype(jnp.bfloat16).reshape(R * TB, n_user)
    edge_ui = edge_ui_ref[...].astype(jnp.bfloat16).reshape(R * TB, n_item)

    # Batched per-rating aggregation: one M = R*TB matmul per side against the
    # hoisted bf16 pre-products uhw = user_h @ Wgu, ihw = item_h @ Wgi.
    gu_all = jnp.maximum(
        jnp.dot(edge_iu, uhw_ref[...], preferred_element_type=f32)
        + bgu_ref[...], 0.0)                                         # (R*TB, E)
    gi_all = jnp.maximum(
        jnp.dot(edge_ui, ihw_ref[...], preferred_element_type=f32)
        + bgi_ref[...], 0.0)                                         # (R*TB, E)

    # fc1 on the rating-wise concat: lane-concat the E-wide chunks and do a
    # single K = R*E matmul (instead of R separate K=E dots).
    gu_cat = jnp.concatenate(
        [gu_all[r * TB:(r + 1) * TB, :] for r in range(R)], axis=-1)  # (TB, R*E)
    gi_cat = jnp.concatenate(
        [gi_all[r * TB:(r + 1) * TB, :] for r in range(R)], axis=-1)
    gcn_user_out = (jnp.dot(gu_cat, wfu_ref[...], preferred_element_type=f32)
                    + bfu_ref[...])
    gcn_item_out = (jnp.dot(gi_cat, wfi_ref[...], preferred_element_type=f32)
                    + bfi_ref[...])

    user_emb = user_emb_ref[...]
    item_emb = item_emb_ref[...]

    # l1 on the 4-way interaction concat: one K = 4E (= 128-lane) matmul.
    inter = jnp.concatenate([user_emb * item_emb,
                             user_emb * gcn_item_out,
                             gcn_user_out * item_emb,
                             gcn_user_out * gcn_item_out], axis=-1)   # (TB, 4E)
    x1 = jnp.maximum(
        jnp.dot(inter, wl1_ref[...], preferred_element_type=f32) + bl1_ref[...], 0.0)
    x2 = jnp.maximum(
        jnp.dot(x1, wl2_ref[...], preferred_element_type=f32) + bl2_ref[...], 0.0)
    x3 = jnp.dot(x2, wl3_ref[...], preferred_element_type=f32) + bl3_ref[...]

    # Per-id biases are added outside the kernel.
    out_ref[...] = x3


def _choose_batch_tile(B, block_b):
    """32-aligned batch tile + padded batch size (no whole-batch fallback)."""
    tb = min(block_b, ((B + 31) // 32) * 32)
    tb = max(32, (tb // 32) * 32)
    padded = ((B + tb - 1) // tb) * tb
    return tb, padded


def _vmem_limit_bytes():
    """~3/4 of physical VMEM, capped at 96 MiB (v5e/v6e: 96 MiB, v7x: 48 MiB)."""
    cap = 64 * 1024 * 1024
    try:
        cap = int(pltpu.get_tpu_info().vmem_capacity_bytes)
    except Exception:
        pass
    return min((cap * 3) // 4, 96 * 1024 * 1024)


def gcmc_forward(params, user_id, item_id, edge_IU, edge_UI, *, block_b=256):
    """Pallas-backed GCMC forward (eval mode). Returns shape (B,)."""
    B = user_id.shape[0]
    E = params["user_embedding"].shape[1]
    n_rating, _, n_user = edge_IU.shape
    n_item = edge_UI.shape[2]

    user_emb = params["user_embedding"][user_id]          # (B, E) f32
    item_emb = params["item_embedding"][item_id]          # (B, E) f32
    user_b = params["user_bias"][user_id][:, 0]           # (B,)
    item_b = params["item_bias"][item_id][:, 0]           # (B,)

    # Hoisted ExE pre-products (tiny [n, E] results), shipped once as bf16
    # residents for the native bf16 MXU path inside the kernel.
    uhw = jnp.dot(params["user_embedding"], params["gcn_user_w_t"],
                  preferred_element_type=jnp.float32).astype(jnp.bfloat16)
    ihw = jnp.dot(params["item_embedding"], params["gcn_item_w_t"],
                  preferred_element_type=jnp.float32).astype(jnp.bfloat16)

    # 0/1 adjacency is exact in int8 -> 4x fewer HBM bytes on the dominant stream.
    edge_IU_i8 = edge_IU.astype(jnp.int8)
    edge_UI_i8 = edge_UI.astype(jnp.int8)

    TB, Bp = _choose_batch_tile(B, block_b)
    if Bp != B:
        pad = Bp - B
        user_emb = jnp.pad(user_emb, ((0, pad), (0, 0)))
        item_emb = jnp.pad(item_emb, ((0, pad), (0, 0)))
        edge_IU_i8 = jnp.pad(edge_IU_i8, ((0, 0), (0, pad), (0, 0)))
        edge_UI_i8 = jnp.pad(edge_UI_i8, ((0, 0), (0, pad), (0, 0)))
    grid = (Bp // TB,)

    batch2 = lambda i: (i, 0)      # (Bp, x) tensors tiled along batch
    batch3 = lambda i: (0, i, 0)   # (R, Bp, x) tensors tiled along batch

    def full_spec(arr):            # resident whole-array block (weights)
        nd = arr.ndim
        return pl.BlockSpec(arr.shape, lambda i, nd=nd: (0,) * nd)

    inputs = [
        user_emb, item_emb, edge_IU_i8, edge_UI_i8,
        uhw, ihw,
        params["gcn_user_b"], params["gcn_item_b"],
        params["fc1_user_w_t"], params["fc1_user_b"],
        params["fc1_item_w_t"], params["fc1_item_b"],
        params["l1_w_t"], params["l1_b"],
        params["l2_w_t"], params["l2_b"],
        params["l3_w_t"], params["l3_b"],
    ]
    in_specs = [
        pl.BlockSpec((TB, E), batch2),                    # user_emb
        pl.BlockSpec((TB, E), batch2),                    # item_emb
        pl.BlockSpec((n_rating, TB, n_user), batch3),     # edge_IU (int8)
        pl.BlockSpec((n_rating, TB, n_item), batch3),     # edge_UI (int8)
        full_spec(uhw),                                   # user_h @ Wgu (bf16)
        full_spec(ihw),                                   # item_h @ Wgi (bf16)
        full_spec(params["gcn_user_b"]),
        full_spec(params["gcn_item_b"]),
        full_spec(params["fc1_user_w_t"]),
        full_spec(params["fc1_user_b"]),
        full_spec(params["fc1_item_w_t"]),
        full_spec(params["fc1_item_b"]),
        full_spec(params["l1_w_t"]),
        full_spec(params["l1_b"]),
        full_spec(params["l2_w_t"]),
        full_spec(params["l2_b"]),
        full_spec(params["l3_w_t"]),
        full_spec(params["l3_b"]),
    ]
    assert len(in_specs) == len(inputs)

    out = pl.pallas_call(
        functools.partial(gcmc_kernel, n_rating),
        out_shape=jax.ShapeDtypeStruct((Bp, 1), jnp.float32),
        grid=grid,
        in_specs=in_specs,
        out_specs=pl.BlockSpec((TB, 1), batch2),
        compiler_params=pltpu.CompilerParams(
            dimension_semantics=("parallel",),
            vmem_limit_bytes=_vmem_limit_bytes()),
    )(*inputs)

    return out[:B, 0] + user_b + item_b


def gcmc_reference(params, user_id, item_id, edge_IU, edge_UI):
    """Pure-JAX f32 reference (mirrors the PyTorch forward in eval mode)."""
    user_emb = params["user_embedding"][user_id]
    item_emb = params["item_embedding"][item_id]
    user_h = params["user_embedding"]
    item_h = params["item_embedding"]
    n_rating = edge_IU.shape[0]

    gu_list, gi_list = [], []
    for n in range(n_rating):
        gu = jnp.maximum(edge_IU[n] @ user_h @ params["gcn_user_w_t"]
                         + params["gcn_user_b"], 0.0)
        gi = jnp.maximum(edge_UI[n] @ item_h @ params["gcn_item_w_t"]
                         + params["gcn_item_b"], 0.0)
        gu_list.append(gu)
        gi_list.append(gi)
    gcn_user_h = jnp.concatenate(gu_list, axis=-1)
    gcn_item_h = jnp.concatenate(gi_list, axis=-1)
    gcn_user_out = gcn_user_h @ params["fc1_user_w_t"] + params["fc1_user_b"]
    gcn_item_out = gcn_item_h @ params["fc1_item_w_t"] + params["fc1_item_b"]

    x = jnp.concatenate([user_emb * item_emb,
                         user_emb * gcn_item_out,
                         gcn_user_out * item_emb,
                         gcn_user_out * gcn_item_out], axis=-1)
    x1 = jnp.maximum(x @ params["l1_w_t"] + params["l1_b"], 0.0)
    x2 = jnp.maximum(x1 @ params["l2_w_t"] + params["l2_b"], 0.0)
    x3 = (x2 @ params["l3_w_t"] + params["l3_b"]).reshape(-1)
    return x3 + params["user_bias"][user_id].reshape(-1) \
              + params["item_bias"][item_id].reshape(-1)


def init_params(key, n_user, n_item, n_rating, E=32, H=32):
    ks = jax.random.split(key, 16)

    def xavier(k, shape):
        limit = (6.0 / (shape[0] + shape[1])) ** 0.5
        return jax.random.uniform(k, shape, jnp.float32, -limit, limit)

    def linear(kw, kb, fan_in, fan_out):
        # PyTorch nn.Linear default init: U(-1/sqrt(fan_in), 1/sqrt(fan_in)).
        bound = 1.0 / (fan_in ** 0.5)
        w_t = jax.random.uniform(kw, (fan_in, fan_out), jnp.float32, -bound, bound)
        b = jax.random.uniform(kb, (1, fan_out), jnp.float32, -bound, bound)
        return w_t, b

    p = {}
    p["user_embedding"] = xavier(ks[0], (n_user, E))
    p["item_embedding"] = xavier(ks[1], (n_item, E))
    p["gcn_user_w_t"], p["gcn_user_b"] = linear(ks[2], ks[3], E, E)
    p["gcn_item_w_t"], p["gcn_item_b"] = linear(ks[4], ks[5], E, E)
    p["fc1_user_w_t"], p["fc1_user_b"] = linear(ks[6], ks[7], n_rating * E, E)
    p["fc1_item_w_t"], p["fc1_item_b"] = linear(ks[8], ks[9], n_rating * E, E)
    p["l1_w_t"], p["l1_b"] = linear(ks[10], ks[11], 4 * E, 2 * H)
    p["l2_w_t"], p["l2_b"] = linear(ks[12], ks[13], 2 * H, H)
    p["l3_w_t"], p["l3_b"] = linear(ks[14], ks[15], H, 1)
    p["user_bias"] = jnp.zeros((n_user, 1), jnp.float32)   # reset_parameters: zeros
    p["item_bias"] = jnp.zeros((n_item, 1), jnp.float32)
    return p


if __name__ == "__main__":
    n_user, n_item, n_rating = 16, 24, 3
    E, H, B = 32, 32, 8

    key = jax.random.PRNGKey(0)
    kp, kx1, kx2, ke1, ke2 = jax.random.split(key, 5)

    params = init_params(kp, n_user, n_item, n_rating, E, H)

    # x: (B, 2) int ids -> user_id = x[:, 0], item_id = x[:, 1]
    user_id = jax.random.randint(kx1, (B,), 0, n_user)
    item_id = jax.random.randint(kx2, (B,), 0, n_item)

    # Per-rating adjacency rows for the batch (dense, 0/1 floats).
    edge_UI = jax.random.bernoulli(ke1, 0.3, (n_rating, B, n_item)).astype(jnp.float32)
    edge_IU = jax.random.bernoulli(ke2, 0.3, (n_rating, B, n_user)).astype(jnp.float32)

    out = gcmc_forward(params, user_id, item_id, edge_IU, edge_UI)
    out = jax.block_until_ready(out)
    ref = gcmc_reference(params, user_id, item_id, edge_IU, edge_UI)
    assert out.shape == (B,)
    # bf16 rounding of the hoisted user_h@Wgu / item_h@Wgi pre-products shifts
    # numerics slightly vs the pure-f32 reference (accumulation stays f32).
    assert jnp.allclose(out, ref, atol=2e-2, rtol=2e-2), (out, ref)

    # Second check: multi-tile grid with batch padding (B not a tile multiple).
    B2 = 80
    k1, k2, k3, k4 = jax.random.split(jax.random.PRNGKey(1), 4)
    uid2 = jax.random.randint(k1, (B2,), 0, n_user)
    iid2 = jax.random.randint(k2, (B2,), 0, n_item)
    eUI2 = jax.random.bernoulli(k3, 0.3, (n_rating, B2, n_item)).astype(jnp.float32)
    eIU2 = jax.random.bernoulli(k4, 0.3, (n_rating, B2, n_user)).astype(jnp.float32)
    out2 = jax.block_until_ready(
        gcmc_forward(params, uid2, iid2, eIU2, eUI2, block_b=32))
    ref2 = gcmc_reference(params, uid2, iid2, eIU2, eUI2)
    assert out2.shape == (B2,)
    assert jnp.allclose(out2, ref2, atol=2e-2, rtol=2e-2), (out2, ref2)

    print("KERNEL_OK")
</pallas_src>

<mosaic_0001>
module attributes {stable_mosaic.version = 11 : i64} {
  func.func @gcmc_kernel(%arg0: i32, %arg1: memref<32x32xf32, #tpu.memory_space<vmem>>, %arg2: memref<32x32xf32, #tpu.memory_space<vmem>>, %arg3: memref<3x32x16xi8, #tpu.memory_space<vmem>>, %arg4: memref<3x32x24xi8, #tpu.memory_space<vmem>>, %arg5: memref<16x32xbf16, #tpu.memory_space<vmem>>, %arg6: memref<24x32xbf16, #tpu.memory_space<vmem>>, %arg7: memref<1x32xf32, #tpu.memory_space<vmem>>, %arg8: memref<1x32xf32, #tpu.memory_space<vmem>>, %arg9: memref<96x32xf32, #tpu.memory_space<vmem>>, %arg10: memref<1x32xf32, #tpu.memory_space<vmem>>, %arg11: memref<96x32xf32, #tpu.memory_space<vmem>>, %arg12: memref<1x32xf32, #tpu.memory_space<vmem>>, %arg13: memref<128x64xf32, #tpu.memory_space<vmem>>, %arg14: memref<1x64xf32, #tpu.memory_space<vmem>>, %arg15: memref<64x32xf32, #tpu.memory_space<vmem>>, %arg16: memref<1x32xf32, #tpu.memory_space<vmem>>, %arg17: memref<32x1xf32, #tpu.memory_space<vmem>>, %arg18: memref<1x1xf32, #tpu.memory_space<vmem>>, %arg19: memref<32x1xf32, #tpu.memory_space<vmem>>) attributes {dimension_semantics = [#tpu.dimension_semantics<parallel>], iteration_bounds = array<i64: 1>, scalar_prefetch = 0 : i64, scratch_operands = 0 : i64, tpu.core_type = #tpu.core_type<tc>, window_params = [{transform_indices = @transform_0, window_bounds = array<i64: 32, 32>}, {transform_indices = @transform_1, window_bounds = array<i64: 32, 32>}, {transform_indices = @transform_2, window_bounds = array<i64: 3, 32, 16>}, {transform_indices = @transform_3, window_bounds = array<i64: 3, 32, 24>}, {pipeline_mode = #tpu.pipeline_mode<synchronous>, transform_indices = @transform_4, window_bounds = array<i64: 16, 32>}, {pipeline_mode = #tpu.pipeline_mode<synchronous>, transform_indices = @transform_5, window_bounds = array<i64: 24, 32>}, {pipeline_mode = #tpu.pipeline_mode<synchronous>, transform_indices = @transform_6, window_bounds = array<i64: 1, 32>}, {pipeline_mode = #tpu.pipeline_mode<synchronous>, transform_indices = @transform_7, window_bounds = array<i64: 1, 32>}, {pipeline_mode = #tpu.pipeline_mode<synchronous>, transform_indices = @transform_8, window_bounds = array<i64: 96, 32>}, {pipeline_mode = #tpu.pipeline_mode<synchronous>, transform_indices = @transform_9, window_bounds = array<i64: 1, 32>}, {pipeline_mode = #tpu.pipeline_mode<synchronous>, transform_indices = @transform_10, window_bounds = array<i64: 96, 32>}, {pipeline_mode = #tpu.pipeline_mode<synchronous>, transform_indices = @transform_11, window_bounds = array<i64: 1, 32>}, {pipeline_mode = #tpu.pipeline_mode<synchronous>, transform_indices = @transform_12, window_bounds = array<i64: 128, 64>}, {pipeline_mode = #tpu.pipeline_mode<synchronous>, transform_indices = @transform_13, window_bounds = array<i64: 1, 64>}, {pipeline_mode = #tpu.pipeline_mode<synchronous>, transform_indices = @transform_14, window_bounds = array<i64: 64, 32>}, {pipeline_mode = #tpu.pipeline_mode<synchronous>, transform_indices = @transform_15, window_bounds = array<i64: 1, 32>}, {pipeline_mode = #tpu.pipeline_mode<synchronous>, transform_indices = @transform_16, window_bounds = array<i64: 32, 1>}, {pipeline_mode = #tpu.pipeline_mode<synchronous>, transform_indices = @transform_17, window_bounds = array<i64: 1, 1>}, {transform_indices = @transform_18, window_bounds = array<i64: 32, 1>}]} {
    %c0 = arith.constant 0 : index
    %c0_0 = arith.constant 0 : index
    %c0_1 = arith.constant 0 : index
    %0 = vector.load %arg3[%c0, %c0_0, %c0_1] : memref<3x32x16xi8, #tpu.memory_space<vmem>>, vector<3x32x16xi8>
    %1 = arith.sitofp %0 : vector<3x32x16xi8> to vector<3x32x16xbf16>
    %2 = vector.shape_cast %1 : vector<3x32x16xbf16> to vector<96x16xbf16>
    %c0_2 = arith.constant 0 : index
    %c0_3 = arith.constant 0 : index
    %c0_4 = arith.constant 0 : index
    %3 = vector.load %arg4[%c0_2, %c0_3, %c0_4] : memref<3x32x24xi8, #tpu.memory_space<vmem>>, vector<3x32x24xi8>
    %4 = arith.sitofp %3 : vector<3x32x24xi8> to vector<3x32x24xbf16>
    %5 = vector.shape_cast %4 : vector<3x32x24xbf16> to vector<96x24xbf16>
    %c0_5 = arith.constant 0 : index
    %c0_6 = arith.constant 0 : index
    %6 = vector.load %arg5[%c0_5, %c0_6] : memref<16x32xbf16, #tpu.memory_space<vmem>>, vector<16x32xbf16>
    %cst = arith.constant dense<0.000000e+00> : vector<96x32xf32>
    %7 = tpu.matmul %2, %6, %cst {dimension_numbers = #tpu.dot_dimension_numbers<[1], [0], [0], [1], [0, 0, 1, 1], [], []>} : vector<96x16xbf16>, vector<16x32xbf16>, vector<96x32xf32> -> vector<96x32xf32>
    %c0_7 = arith.constant 0 : index
    %c0_8 = arith.constant 0 : index
    %8 = vector.load %arg7[%c0_7, %c0_8] : memref<1x32xf32, #tpu.memory_space<vmem>>, vector<1x32xf32>
    %9 = vector.broadcast %8 : vector<1x32xf32> to vector<96x32xf32>
    %10 = arith.addf %7, %9 : vector<96x32xf32>
    %cst_9 = arith.constant 0.000000e+00 : f32
    %11 = vector.broadcast %cst_9 : f32 to vector<96x32xf32>
    %12 = arith.maximumf %10, %11 : vector<96x32xf32>
    %c0_10 = arith.constant 0 : index
    %c0_11 = arith.constant 0 : index
    %13 = vector.load %arg6[%c0_10, %c0_11] : memref<24x32xbf16, #tpu.memory_space<vmem>>, vector<24x32xbf16>
    %cst_12 = arith.constant dense<0.000000e+00> : vector<96x32xf32>
    %14 = tpu.matmul %5, %13, %cst_12 {dimension_numbers = #tpu.dot_dimension_numbers<[1], [0], [0], [1], [0, 0, 1, 1], [], []>} : vector<96x24xbf16>, vector<24x32xbf16>, vector<96x32xf32> -> vector<96x32xf32>
    %c0_13 = arith.constant 0 : index
    %c0_14 = arith.constant 0 : index
    %15 = vector.load %arg8[%c0_13, %c0_14] : memref<1x32xf32, #tpu.memory_space<vmem>>, vector<1x32xf32>
    %16 = vector.broadcast %15 : vector<1x32xf32> to vector<96x32xf32>
    %17 = arith.addf %14, %16 : vector<96x32xf32>
    %cst_15 = arith.constant 0.000000e+00 : f32
    %18 = vector.broadcast %cst_15 : f32 to vector<96x32xf32>
    %19 = arith.maximumf %17, %18 : vector<96x32xf32>
    %20 = vector.extract_strided_slice %12 {offsets = [0, 0], sizes = [32, 32], strides = [1, 1]} : vector<96x32xf32> to vector<32x32xf32>
    %21 = vector.extract_strided_slice %12 {offsets = [32, 0], sizes = [32, 32], strides = [1, 1]} : vector<96x32xf32> to vector<32x32xf32>
    %22 = vector.extract_strided_slice %12 {offsets = [64, 0], sizes = [32, 32], strides = [1, 1]} : vector<96x32xf32> to vector<32x32xf32>
    %23 = tpu.concatenate %20, %21, %22 in 1 : vector<32x32xf32>, vector<32x32xf32>, vector<32x32xf32> -> vector<32x96xf32>
    %24 = vector.extract_strided_slice %19 {offsets = [0, 0], sizes = [32, 32], strides = [1, 1]} : vector<96x32xf32> to vector<32x32xf32>
    %25 = vector.extract_strided_slice %19 {offsets = [32, 0], sizes = [32, 32], strides = [1, 1]} : vector<96x32xf32> to vector<32x32xf32>
    %26 = vector.extract_strided_slice %19 {offsets = [64, 0], sizes = [32, 32], strides = [1, 1]} : vector<96x32xf32> to vector<32x32xf32>
    %27 = tpu.concatenate %24, %25, %26 in 1 : vector<32x32xf32>, vector<32x32xf32>, vector<32x32xf32> -> vector<32x96xf32>
    %c0_16 = arith.constant 0 : index
    %c0_17 = arith.constant 0 : index
    %28 = vector.load %arg9[%c0_16, %c0_17] : memref<96x32xf32, #tpu.memory_space<vmem>>, vector<96x32xf32>
    %cst_18 = arith.constant dense<0.000000e+00> : vector<32x32xf32>
    %29 = tpu.matmul %23, %28, %cst_18 {dimension_numbers = #tpu.dot_dimension_numbers<[1], [0], [0], [1], [0, 0, 1, 1], [], []>} : vector<32x96xf32>, vector<96x32xf32>, vector<32x32xf32> -> vector<32x32xf32>
    %c0_19 = arith.constant 0 : index
    %c0_20 = arith.constant 0 : index
    %30 = vector.load %arg10[%c0_19, %c0_20] : memref<1x32xf32, #tpu.memory_space<vmem>>, vector<1x32xf32>
    %31 = vector.broadcast %30 : vector<1x32xf32> to vector<32x32xf32>
    %32 = arith.addf %29, %31 : vector<32x32xf32>
    %c0_21 = arith.constant 0 : index
    %c0_22 = arith.constant 0 : index
    %33 = vector.load %arg11[%c0_21, %c0_22] : memref<96x32xf32, #tpu.memory_space<vmem>>, vector<96x32xf32>
    %cst_23 = arith.constant dense<0.000000e+00> : vector<32x32xf32>
    %34 = tpu.matmul %27, %33, %cst_23 {dimension_numbers = #tpu.dot_dimension_numbers<[1], [0], [0], [1], [0, 0, 1, 1], [], []>} : vector<32x96xf32>, vector<96x32xf32>, vector<32x32xf32> -> vector<32x32xf32>
    %c0_24 = arith.constant 0 : index
    %c0_25 = arith.constant 0 : index
    %35 = vector.load %arg12[%c0_24, %c0_25] : memref<1x32xf32, #tpu.memory_space<vmem>>, vector<1x32xf32>
    %36 = vector.broadcast %35 : vector<1x32xf32> to vector<32x32xf32>
    %37 = arith.addf %34, %36 : vector<32x32xf32>
    %c0_26 = arith.constant 0 : index
    %c0_27 = arith.constant 0 : index
    %38 = vector.load %arg1[%c0_26, %c0_27] : memref<32x32xf32, #tpu.memory_space<vmem>>, vector<32x32xf32>
    %c0_28 = arith.constant 0 : index
    %c0_29 = arith.constant 0 : index
    %39 = vector.load %arg2[%c0_28, %c0_29] : memref<32x32xf32, #tpu.memory_space<vmem>>, vector<32x32xf32>
    %40 = arith.mulf %38, %39 : vector<32x32xf32>
    %41 = arith.mulf %38, %37 : vector<32x32xf32>
    %42 = arith.mulf %32, %39 : vector<32x32xf32>
    %43 = arith.mulf %32, %37 : vector<32x32xf32>
    %44 = tpu.concatenate %40, %41, %42, %43 in 1 : vector<32x32xf32>, vector<32x32xf32>, vector<32x32xf32>, vector<32x32xf32> -> vector<32x128xf32>
    %c0_30 = arith.constant 0 : index
    %c0_31 = arith.constant 0 : index
    %45 = vector.load %arg13[%c0_30, %c0_31] : memref<128x64xf32, #tpu.memory_space<vmem>>, vector<128x64xf32>
    %cst_32 = arith.constant dense<0.000000e+00> : vector<32x64xf32>
    %46 = tpu.matmul %44, %45, %cst_32 {dimension_numbers = #tpu.dot_dimension_numbers<[1], [0], [0], [1], [0, 0, 1, 1], [], []>} : vector<32x128xf32>, vector<128x64xf32>, vector<32x64xf32> -> vector<32x64xf32>
    %c0_33 = arith.constant 0 : index
    %c0_34 = arith.constant 0 : index
    %47 = vector.load %arg14[%c0_33, %c0_34] : memref<1x64xf32, #tpu.memory_space<vmem>>, vector<1x64xf32>
    %48 = vector.broadcast %47 : vector<1x64xf32> to vector<32x64xf32>
    %49 = arith.addf %46, %48 : vector<32x64xf32>
    %cst_35 = arith.constant 0.000000e+00 : f32
    %50 = vector.broadcast %cst_35 : f32 to vector<32x64xf32>
    %51 = arith.maximumf %49, %50 : vector<32x64xf32>
    %c0_36 = arith.constant 0 : index
    %c0_37 = arith.constant 0 : index
    %52 = vector.load %arg15[%c0_36, %c0_37] : memref<64x32xf32, #tpu.memory_space<vmem>>, vector<64x32xf32>
    %cst_38 = arith.constant dense<0.000000e+00> : vector<32x32xf32>
    %53 = tpu.matmul %51, %52, %cst_38 {dimension_numbers = #tpu.dot_dimension_numbers<[1], [0], [0], [1], [0, 0, 1, 1], [], []>} : vector<32x64xf32>, vector<64x32xf32>, vector<32x32xf32> -> vector<32x32xf32>
    %c0_39 = arith.constant 0 : index
    %c0_40 = arith.constant 0 : index
    %54 = vector.load %arg16[%c0_39, %c0_40] : memref<1x32xf32, #tpu.memory_space<vmem>>, vector<1x32xf32>
    %55 = vector.broadcast %54 : vector<1x32xf32> to vector<32x32xf32>
    %56 = arith.addf %53, %55 : vector<32x32xf32>
    %cst_41 = arith.constant 0.000000e+00 : f32
    %57 = vector.broadcast %cst_41 : f32 to vector<32x32xf32>
    %58 = arith.maximumf %56, %57 : vector<32x32xf32>
    %c0_42 = arith.constant 0 : index
    %c0_43 = arith.constant 0 : index
    %59 = vector.load %arg17[%c0_42, %c0_43] : memref<32x1xf32, #tpu.memory_space<vmem>>, vector<32x1xf32>
    %cst_44 = arith.constant dense<0.000000e+00> : vector<32x1xf32>
    %60 = tpu.matmul %58, %59, %cst_44 {dimension_numbers = #tpu.dot_dimension_numbers<[1], [0], [0], [1], [0, 0, 1, 1], [], []>} : vector<32x32xf32>, vector<32x1xf32>, vector<32x1xf32> -> vector<32x1xf32>
    %c0_45 = arith.constant 0 : index
    %c0_46 = arith.constant 0 : index
    %61 = vector.load %arg18[%c0_45, %c0_46] : memref<1x1xf32, #tpu.memory_space<vmem>>, vector<1x1xf32>
    %62 = vector.broadcast %61 : vector<1x1xf32> to vector<32x1xf32>
    %63 = arith.addf %60, %62 : vector<32x1xf32>
    %c0_47 = arith.constant 0 : index
    %c0_48 = arith.constant 0 : index
    %64 = vector.load %arg19[%c0_47, %c0_48] : memref<32x1xf32, #tpu.memory_space<vmem>>, vector<32x1xf32>
    tpu.vector_store %arg19[%c0_47, %c0_48], %63 {strides = array<i32>} : memref<32x1xf32, #tpu.memory_space<vmem>>, vector<32x1xf32>,
    return
  }
  func.func @transform_0(%arg0: i32) -> (i32, i32) {
    %c0_i32 = arith.constant 0 : i32
    %c0_i32_0 = arith.constant 0 : i32
    return %arg0, %c0_i32 : i32, i32
  }
  func.func @transform_1(%arg0: i32) -> (i32, i32) {
    %c0_i32 = arith.constant 0 : i32
    %c0_i32_0 = arith.constant 0 : i32
    return %arg0, %c0_i32 : i32, i32
  }
  func.func @transform_2(%arg0: i32) -> (i32, i32, i32) {
    %c0_i32 = arith.constant 0 : i32
    %c0_i32_0 = arith.constant 0 : i32
    %c0_i32_1 = arith.constant 0 : i32
    return %c0_i32, %arg0, %c0_i32_0 : i32, i32, i32
  }
  func.func @transform_3(%arg0: i32) -> (i32, i32, i32) {
    %c0_i32 = arith.constant 0 : i32
    %c0_i32_0 = arith.constant 0 : i32
    %c0_i32_1 = arith.constant 0 : i32
    return %c0_i32, %arg0, %c0_i32_0 : i32, i32, i32
  }
  func.func @transform_4(%arg0: i32) -> (i32, i32) {
    %c0_i32 = arith.constant 0 : i32
    %c0_i32_0 = arith.constant 0 : i32
    %c0_i32_1 = arith.constant 0 : i32
    return %c0_i32, %c0_i32_0 : i32, i32
  }
  func.func @transform_5(%arg0: i32) -> (i32, i32) {
    %c0_i32 = arith.constant 0 : i32
    %c0_i32_0 = arith.constant 0 : i32
    %c0_i32_1 = arith.constant 0 : i32
    return %c0_i32, %c0_i32_0 : i32, i32
  }
  func.func @transform_6(%arg0: i32) -> (i32, i32) {
    %c0_i32 = arith.constant 0 : i32
    %c0_i32_0 = arith.constant 0 : i32
    %c0_i32_1 = arith.constant 0 : i32
    return %c0_i32, %c0_i32_0 : i32, i32
  }
  func.func @transform_7(%arg0: i32) -> (i32, i32) {
    %c0_i32 = arith.constant 0 : i32
    %c0_i32_0 = arith.constant 0 : i32
    %c0_i32_1 = arith.constant 0 : i32
    return %c0_i32, %c0_i32_0 : i32, i32
  }
  func.func @transform_8(%arg0: i32) -> (i32, i32) {
    %c0_i32 = arith.constant 0 : i32
    %c0_i32_0 = arith.constant 0 : i32
    %c0_i32_1 = arith.constant 0 : i32
    return %c0_i32, %c0_i32_0 : i32, i32
  }
  func.func @transform_9(%arg0: i32) -> (i32, i32) {
    %c0_i32 = arith.constant 0 : i32
    %c0_i32_0 = arith.constant 0 : i32
    %c0_i32_1 = arith.constant 0 : i32
    return %c0_i32, %c0_i32_0 : i32, i32
  }
  func.func @transform_10(%arg0: i32) -> (i32, i32) {
    %c0_i32 = arith.constant 0 : i32
    %c0_i32_0 = arith.constant 0 : i32
    %c0_i32_1 = arith.constant 0 : i32
    return %c0_i32, %c0_i32_0 : i32, i32
  }
  func.func @transform_11(%arg0: i32) -> (i32, i32) {
    %c0_i32 = arith.constant 0 : i32
    %c0_i32_0 = arith.constant 0 : i32
    %c0_i32_1 = arith.constant 0 : i32
    return %c0_i32, %c0_i32_0 : i32, i32
  }
  func.func @transform_12(%arg0: i32) -> (i32, i32) {
    %c0_i32 = arith.constant 0 : i32
    %c0_i32_0 = arith.constant 0 : i32
    %c0_i32_1 = arith.constant 0 : i32
    return %c0_i32, %c0_i32_0 : i32, i32
  }
  func.func @transform_13(%arg0: i32) -> (i32, i32) {
    %c0_i32 = arith.constant 0 : i32
    %c0_i32_0 = arith.constant 0 : i32
    %c0_i32_1 = arith.constant 0 : i32
    return %c0_i32, %c0_i32_0 : i32, i32
  }
  func.func @transform_14(%arg0: i32) -> (i32, i32) {
    %c0_i32 = arith.constant 0 : i32
    %c0_i32_0 = arith.constant 0 : i32
    %c0_i32_1 = arith.constant 0 : i32
    return %c0_i32, %c0_i32_0 : i32, i32
  }
  func.func @transform_15(%arg0: i32) -> (i32, i32) {
    %c0_i32 = arith.constant 0 : i32
    %c0_i32_0 = arith.constant 0 : i32
    %c0_i32_1 = arith.constant 0 : i32
    return %c0_i32, %c0_i32_0 : i32, i32
  }
  func.func @transform_16(%arg0: i32) -> (i32, i32) {
    %c0_i32 = arith.constant 0 : i32
    %c0_i32_0 = arith.constant 0 : i32
    %c0_i32_1 = arith.constant 0 : i32
    return %c0_i32, %c0_i32_0 : i32, i32
  }
  func.func @transform_17(%arg0: i32) -> (i32, i32) {
    %c0_i32 = arith.constant 0 : i32
    %c0_i32_0 = arith.constant 0 : i32
    %c0_i32_1 = arith.constant 0 : i32
    return %c0_i32, %c0_i32_0 : i32, i32
  }
  func.func @transform_18(%arg0: i32) -> (i32, i32) {
    %c0_i32 = arith.constant 0 : i32
    %c0_i32_0 = arith.constant 0 : i32
    return %arg0, %c0_i32 : i32, i32
  }
}

</mosaic_0001>

<bundles_post_ra>
// kernel: tpu_custom_call.1
= control target key start
LH: loop header
LB: loop body
LE: loop exit
PB: predicated region body
PF: predicated region fallthrough
CT: control target
= control target key end

     0   :  { %vm317_vm0 = vcmask 1043456   ;;  %vm182_vm1 = vcmask 130048   ;;  %vm298_vm2 = vcmask 195584   ;;  %vm409_vm3 = vcmask 523264   ;;  %s1375_s5 = inlined_call_operand.vmem [shape: bf16[24,32], index: 5, kind: input, shape index: {}]   ;;  %s1376_s4 = inlined_call_operand.vmem [shape: bf16[16,32], index: 4, kind: input, shape index: {}]   ;;  %s1377_s2 = inlined_call_operand.vmem [shape: s8[3,32,16], index: 2, kind: input, shape index: {}]   ;;  %s1378_s3 = inlined_call_operand.vmem [shape: s8[3,32,24], index: 3, kind: input, shape index: {}]   ;;  %s1379_s6 = inlined_call_operand.vmem [shape: f32[1,32], index: 6, kind: input, shape index: {}]   ;;  %s1380_s7 = inlined_call_operand.vmem [shape: f32[1,32], index: 7, kind: input, shape index: {}]   ;;  %s1381_s9 = inlined_call_operand.vmem [shape: f32[1,32], index: 9, kind: input, shape index: {}]   ;;  %s1382_s8 = inlined_call_operand.vmem [shape: f32[96,32], index: 8, kind: input, shape index: {}]   ;;  %s1383_s10 = inlined_call_operand.vmem [shape: f32[96,32], index: 10, kind: input, shape index: {}]   ;;  %s1384_s11 = inlined_call_operand.vmem [shape: f32[1,32], index: 11, kind: input, shape index: {}]   ;;  %s1385_s1 = inlined_call_operand.vmem [shape: f32[32,32], index: 1, kind: input, shape index: {}]   ;;  %s1386_s0 = inlined_call_operand.vmem [shape: f32[32,32], index: 0, kind: input, shape index: {}]   ;;  %s1387_s13 = inlined_call_operand.vmem [shape: f32[1,64], index: 13, kind: input, shape index: {}]   ;;  %s1388_s12 = inlined_call_operand.vmem [shape: f32[128,64], index: 12, kind: input, shape index: {}]   ;;  %s1389_s14 = inlined_call_operand.vmem [shape: f32[64,32], index: 14, kind: input, shape index: {}]   ;;  %s1390_s15 = inlined_call_operand.vmem [shape: f32[1,32], index: 15, kind: input, shape index: {}]   ;;  %s1391_s16 = inlined_call_operand.vmem [shape: f32[32,1], index: 16, kind: input, shape index: {}]   ;;  %s1392_s17 = inlined_call_operand.<no memory space> [shape: f32[1,1], index: 17, kind: input, shape index: {}]   ;;  %s1393_s18 = inlined_call_operand.vmem [shape: f32[32,1], index: 18, kind: output, shape index: {}]  }
   0x1   :  { %1396 = sst [smem:[#allocation3_spill]] %s1375_s5  ;;  %v101_v4 = vld [vmem:[%s1378_s3] sm:$0xff]  ;;  %v102_v43 = vld [vmem:[%s1378_s3 + $0x8] sm:$0xff]  ;;  %vm404_vm4 = vcmask 261120   ;;  %vm470_vm5 = vcmask 785408   ;;  %vm812_vm6 = vcmask 7168  }
   0x2   :  { %1397 = sst [smem:[#allocation4_spill]] %s1376_s4  ;;  %v104_v7 = vunpack.c.0.s8 %v101_v4  ;;  %v105_v8 = vunpack.c.1.s8 %v101_v4  ;;  %v106_v26 = vunpack.c.2.s8 %v101_v4  ;;  %v107_v27 = vunpack.c.3.s8 %v101_v4 }
   0x3   :  { %1398 = sst [smem:[#allocation5_spill]] %s1377_s2  ;;  %v108_v48 = vunpack.c.0.s8 %v102_v43  ;;  %v109_v49 = vunpack.c.1.s8 %v102_v43 }
   0x4   :  { %1399 = sst [smem:[#allocation6_spill]] %s1387_s13  ;;  %v116_v12 = vcvt.s32.f32 %v104_v7  ;;  %v117_v13 = vcvt.s32.f32 %v105_v8  ;;  %v118_v32 = vcvt.s32.f32 %v106_v26  ;;  %v119_v33 = vcvt.s32.f32 %v107_v27 }
   0x5   :  { %s1400_s29 = sld [smem:[#allocation3_spill]]  ;;  %v120_v52 = vcvt.s32.f32 %v108_v48  ;;  %v121_v53 = vcvt.s32.f32 %v109_v49 }
   0x6   :  { %s1401_s13 = sld [smem:[#allocation4_spill]]  ;;  %v128_v18 = vpack.c.bf16 %v116_v12, %v116_v12  ;;  %v129_v19 = vpack.c.bf16 %v117_v13, %v117_v13  ;;  %v130_v36 = vpack.c.bf16 %v118_v32, %v118_v32  ;;  %v131_v37 = vpack.c.bf16 %v119_v33, %v119_v33 }
   0x7   :  { %s1402_s20 = sld [smem:[#allocation5_spill]]  ;;  %v132_v56 = vpack.c.bf16 %v120_v52, %v120_v52  ;;  %v133_v57 = vpack.c.bf16 %v121_v53, %v121_v53 }
   0x8   :  { %v271_v24 = vunpack.c.l.b16 %v128_v18  ;;  %v272_v25 = vunpack.c.l.b16 %v129_v19  ;;  %v273_v40 = vunpack.c.l.b16 %v130_v36  ;;  %v274_v41 = vunpack.c.l.b16 %v131_v37 }
   0x9   :  { %v275_v60 = vunpack.c.l.b16 %v132_v56  ;;  %v276_v61 = vunpack.c.l.b16 %v133_v57 }
   0xa   :  { %v283_v29 = vpack.c.b16 %v272_v25, %v271_v24  ;;  %v284_v47 = vpack.c.b16 %v274_v41, %v273_v40 }
   0xb   :  { %v254_v0 = vld [vmem:[%s1400_s29 + $0x8] sm:$0xf]  ;;  %v858_v15 = vld [vmem:[%s1400_s29] sm:$0xff] }
   0xc   :  { %v857_v1 = vld [vmem:[%s1401_s13] sm:$0xff]  ;;  %v294_v2 = vunpack.c.l.b16 %v254_v0 }
   0xd   :  { %v62_v3 = vld [vmem:[%s1402_s20] sm:$0xff]  ;;  %208 = vmatpush.bf16.msra.mxu0 %v857_v1  ;;  %v63_v42 = vld [vmem:[%s1402_s20 + $0x8] sm:$0xff]  ;;  %v285_v1 = vpack.c.b16 %v276_v61, %v275_v60 }
   0xe   :  { %v65_v5 = vunpack.c.0.s8 %v62_v3  ;;  %v66_v6 = vunpack.c.1.s8 %v62_v3  ;;  %v296_v9 = vpack.c.b16 %v294_v2, %v294_v2  ;;  %v67_v20 = vunpack.c.2.s8 %v62_v3 }
   0xf   :  { %v68_v21 = vunpack.c.3.s8 %v62_v3  ;;  %v69_v45 = vunpack.c.0.s8 %v63_v42  ;;  %v70_v46 = vunpack.c.1.s8 %v63_v42  ;;  %v71_v63 = vunpack.c.2.s8 %v63_v42 }
  0x10   :  { %v77_v10 = vcvt.s32.f32 %v65_v5  ;;  %v78_v11 = vcvt.s32.f32 %v66_v6  ;;  %v319_v14 = vsel %vm317_vm0, %v296_v9, 0  ;;  %v79_v30 = vcvt.s32.f32 %v67_v20 }
  0x11   :  { %327 = vmatpush.bf16.msra.mxu1 %v319_v14  ;;  %v80_v31 = vcvt.s32.f32 %v68_v21  ;;  %v81_v50 = vcvt.s32.f32 %v69_v45  ;;  %v82_v51 = vcvt.s32.f32 %v70_v46  ;;  %v72_v0 = vunpack.c.3.s8 %v63_v42 }
  0x12   :  { %v89_v16 = vpack.c.bf16 %v77_v10, %v77_v10  ;;  %v90_v17 = vpack.c.bf16 %v78_v11, %v78_v11  ;;  %v91_v34 = vpack.c.bf16 %v79_v30, %v79_v30  ;;  %v110_v2 = vunpack.c.2.s8 %v102_v43 }
  0x13   :  { %v92_v35 = vpack.c.bf16 %v80_v31, %v80_v31  ;;  %v93_v54 = vpack.c.bf16 %v81_v50, %v81_v50  ;;  %v94_v55 = vpack.c.bf16 %v82_v51, %v82_v51  ;;  %v111_v3 = vunpack.c.3.s8 %v102_v43 }
  0x14   :  { %v158_v22 = vunpack.c.l.b16 %v89_v16  ;;  %v159_v23 = vunpack.c.l.b16 %v90_v17  ;;  %v160_v38 = vunpack.c.l.b16 %v91_v34  ;;  %v83_v4 = vcvt.s32.f32 %v71_v63  ;;  %v64_v16 = vld [vmem:[%s1402_s20 + $0x10] sm:$0xff]  ;;  %s890_s20 = smov 32  }
  0x15   :  { %328 = vmatpush.bf16.msra.mxu1 %v858_v15  ;;  %v161_v39 = vunpack.c.l.b16 %v92_v35  ;;  %v162_v58 = vunpack.c.l.b16 %v93_v54  ;;  %v163_v59 = vunpack.c.l.b16 %v94_v55  ;;  %v84_v5 = vcvt.s32.f32 %v72_v0  ;;  %v103_v17 = vld [vmem:[%s1378_s3 + $0x10] sm:$0xff]  ;;  %v1046_v0 = vld [vmem:[%s1379_s6] ss:$0 sm:$0xff]  ;;  %s891_s6 = smov 64  }
  0x16   :  { %v170_v28 = vpack.c.b16 %v159_v23, %v158_v22  ;;  %v122_v6 = vcvt.s32.f32 %v110_v2  ;;  %v123_v7 = vcvt.s32.f32 %v111_v3  ;;  %v95_v8 = vpack.c.bf16 %v83_v4, %v83_v4  ;;  %v1052_v4 = vld [vmem:[%s1380_s7] ss:$0 sm:$0xff] }
  0x17   :  { %v171_v44 = vpack.c.b16 %v161_v39, %v160_v38  ;;  %v172_v62 = vpack.c.b16 %v163_v59, %v162_v58  ;;  %v96_v9 = vpack.c.bf16 %v84_v5, %v84_v5  ;;  %v73_v19 = vunpack.c.0.s8 %v64_v16 }
  0x18   :  { %825 = vmatmul.msk.bf16.vlgmr.msra.gmra.mxu0 %vm182_vm1, %v170_v28  ;;  %835 = vmatmul.msk.bf16.vlgmr.msra.gmra.mxu1 %vm298_vm2, %v283_v29  ;;  %v134_v10 = vpack.c.bf16 %v122_v6, %v122_v6  ;;  %v135_v11 = vpack.c.bf16 %v123_v7, %v123_v7  ;;  %v164_v12 = vunpack.c.l.b16 %v95_v8  ;;  %v74_v20 = vunpack.c.1.s8 %v64_v16 }
  0x19   :  { %v165_v13 = vunpack.c.l.b16 %v96_v9  ;;  %v112_v22 = vunpack.c.0.s8 %v103_v17  ;;  %v113_v23 = vunpack.c.1.s8 %v103_v17  ;;  %v85_v24 = vcvt.s32.f32 %v73_v19 }
  0x1a   :  { %v277_v14 = vunpack.c.l.b16 %v134_v10  ;;  %v278_v15 = vunpack.c.l.b16 %v135_v11  ;;  %v86_v25 = vcvt.s32.f32 %v74_v20  ;;  %v75_v37 = vunpack.c.2.s8 %v64_v16 }
  0x1b   :  { %v173_v18 = vpack.c.b16 %v165_v13, %v164_v12  ;;  %v124_v26 = vcvt.s32.f32 %v112_v22  ;;  %v125_v27 = vcvt.s32.f32 %v113_v23  ;;  %v97_v28 = vpack.c.bf16 %v85_v24, %v85_v24 }
  0x1c   :  { %v286_v21 = vpack.c.b16 %v278_v15, %v277_v14  ;;  %v98_v29 = vpack.c.bf16 %v86_v25, %v86_v25  ;;  %v76_v38 = vunpack.c.3.s8 %v64_v16  ;;  %v114_v40 = vunpack.c.2.s8 %v103_v17 }
  0x1d   :  { %v136_v30 = vpack.c.bf16 %v124_v26, %v124_v26  ;;  %v137_v31 = vpack.c.bf16 %v125_v27, %v125_v27  ;;  %v166_v32 = vunpack.c.l.b16 %v97_v28  ;;  %v115_v41 = vunpack.c.3.s8 %v103_v17 }
  0x1e   :  { %v167_v33 = vunpack.c.l.b16 %v98_v29  ;;  %v87_v42 = vcvt.s32.f32 %v75_v37  ;;  %v88_v43 = vcvt.s32.f32 %v76_v38 }
  0x1f   :  { %v279_v34 = vunpack.c.l.b16 %v136_v30  ;;  %v280_v35 = vunpack.c.l.b16 %v137_v31  ;;  %v127_v45 = vcvt.s32.f32 %v115_v41 }
  0x20   :  { %v174_v36 = vpack.c.b16 %v167_v33, %v166_v32  ;;  %v99_v46 = vpack.c.bf16 %v87_v42, %v87_v42 }
  0x21   :  { %v287_v39 = vpack.c.b16 %v280_v35, %v279_v34  ;;  %v139_v49 = vpack.c.bf16 %v127_v45, %v127_v45 }
  0x22   :  { %v168_v50 = vunpack.c.l.b16 %v99_v46 }
  0x23   :  { %v282_v53 = vunpack.c.l.b16 %v139_v49 }
  0x28   :  { %826 = vmatmul.msk.bf16.gmra.mxu0 %vm182_vm1, %v171_v44  ;;  %836 = vmatmul.msk.bf16.gmra.mxu1 %vm298_vm2, %v284_v47  ;;  %v126_v44 = vcvt.s32.f32 %v114_v40  ;;  %v100_v47 = vpack.c.bf16 %v88_v43, %v88_v43 }
  0x2a   :  { %v138_v48 = vpack.c.bf16 %v126_v44, %v126_v44  ;;  %v169_v51 = vunpack.c.l.b16 %v100_v47 }
  0x2c   :  { %v281_v52 = vunpack.c.l.b16 %v138_v48  ;;  %v175_v54 = vpack.c.b16 %v169_v51, %v168_v50  ;;  %v465_v50 = vld [vmem:[%s1382_s8 + $0x58] sm:$0xff]  ;;  %v464_v51 = vld [vmem:[%s1382_s8 + $0x50] sm:$0xff] }
  0x2d   :  { %487 = vmatpush.msra.mxu2 %v465_v50 }
  0x2e   :  { %v288_v55 = vpack.c.b16 %v282_v53, %v281_v52  ;;  %v523_v52 = vld [vmem:[%s1383_s10 + $0x58] sm:$0xff]  ;;  %v463_v53 = vld [vmem:[%s1382_s8 + $0x48] sm:$0xff] }
  0x2f   :  { %544 = vmatpush.msra.mxu3 %v523_v52  ;;  %488 = vmatpush.msra.mxu2 %v464_v51 }
  0x31   :  { %489 = vmatpush.msra.mxu2 %v463_v53 }
  0x38   :  { %827 = vmatmul.msk.bf16.gmra.mxu0 %vm182_vm1, %v172_v62  ;;  %837 = vmatmul.msk.bf16.gmra.mxu1 %vm298_vm2, %v285_v1 }
  0x48   :  { %828 = vmatmul.msk.bf16.gmra.mxu0 %vm182_vm1, %v173_v18  ;;  %838 = vmatmul.msk.bf16.gmra.mxu1 %vm298_vm2, %v286_v21 }
  0x58   :  { %829 = vmatmul.msk.bf16.gmra.mxu0 %vm182_vm1, %v174_v36  ;;  %839 = vmatmul.msk.bf16.gmra.mxu1 %vm298_vm2, %v287_v39 }
  0x68   :  { %830 = vmatmul.msk.bf16.gmra.mxu0 %vm182_vm1, %v175_v54  ;;  %840 = vmatmul.msk.bf16.gmra.mxu1 %vm298_vm2, %v288_v55  ;;  %v522_v54 = vld [vmem:[%s1383_s10 + $0x50] sm:$0xff]  ;;  %v521_v55 = vld [vmem:[%s1383_s10 + $0x48] sm:$0xff] }
  0x69   :  { %545 = vmatpush.msra.mxu3 %v522_v54 }
  0x6b   :  { %546 = vmatpush.msra.mxu3 %v521_v55 }
  0x95   :  { %v1027_v56 = vpop.f32.mrf.mxu0  ;;  %v1029_v57 = vpop.f32.mrf.mxu1 }
  0x9d   :  { %v1031_v58 = vpop.f32.mrf.mxu0  ;;  %v1033_v59 = vpop.f32.mrf.mxu1 }
  0xa5   :  { %v1035_v60 = vpop.f32.mrf.mxu0  ;;  %v1037_v61 = vpop.f32.mrf.mxu1 }
  0xad   :  { %v1039_v62 = vpop.f32.mrf.mxu0  ;;  %v1041_v63 = vpop.f32.mrf.mxu1 }
  0xae   :  { %v218_v52 = vadd.f32 %v1046_v0, %v1039_v62  ;;  %v573_v62 = vld [vmem:[%s1385_s1] sm:$0xff] }
  0xb0   :  { %v243_v55 = vmax.f32 %v218_v52, 0.0  ;;  %v657_v52 = vld [vmem:[%s1388_s12 + $0x20] sm:$0xff] }
  0xb5   :  { %v220_v1 = vpop.f32.mrf.mxu0  ;;  %v340_v3 = vpop.f32.mrf.mxu1 }
  0xb6   :  { %v221_v2 = vadd.f32 %v1046_v0, %v220_v1  ;;  %v341_v6 = vadd.f32 %v1052_v4, %v340_v3  ;;  %v462_v1 = vld [vmem:[%s1382_s8 + $0x40] sm:$0xff]  ;;  %v461_v3 = vld [vmem:[%s1382_s8 + $0x38] sm:$0xff] }
  0xb7   :  { %490 = vmatpush.msra.mxu2 %v462_v1 }
  0xb8   :  { %v244_v5 = vmax.f32 %v221_v2, 0.0  ;;  %v364_v8 = vmax.f32 %v341_v6, 0.0  ;;  %v520_v2 = vld [vmem:[%s1383_s10 + $0x40] sm:$0xff]  ;;  %v460_v6 = vld [vmem:[%s1382_s8 + $0x30] sm:$0xff] }
  0xb9   :  { %547 = vmatpush.msra.mxu3 %v520_v2  ;;  %491 = vmatpush.msra.mxu2 %v461_v3 }
  0xba   :  { %376 = vrot.lane.b32.xlu0 %v244_v5, %s890_s20  ;;  %v519_v5 = vld [vmem:[%s1383_s10 + $0x38] sm:$0xff] }
  0xbb   :  { %548 = vmatpush.msra.mxu3 %v519_v5  ;;  %492 = vmatpush.msra.mxu2 %v460_v6 }
  0xbd   :  { %v222_v7 = vpop.f32.mrf.mxu0  ;;  %v342_v10 = vpop.f32.mrf.mxu1 }
  0xbe   :  { %v223_v9 = vadd.f32 %v1046_v0, %v222_v7  ;;  %v343_v12 = vadd.f32 %v1052_v4, %v342_v10  ;;  %v518_v7 = vld [vmem:[%s1383_s10 + $0x30] sm:$0xff]  ;;  %v458_v10 = vld [vmem:[%s1382_s8 + $0x20] sm:$0xff] }
  0xbf   :  { %549 = vmatpush.msra.mxu3 %v518_v7  ;;  %v574_v7 = vld [vmem:[%s1385_s1 + $0x8] sm:$0xff] }
  0xc0   :  { %v245_v11 = vmax.f32 %v223_v9, 0.0  ;;  %v365_v15 = vmax.f32 %v343_v12, 0.0  ;;  %v517_v9 = vld [vmem:[%s1383_s10 + $0x28] sm:$0xff]  ;;  %v456_v12 = vld [vmem:[%s1382_s8 + $0x10] sm:$0xff] }
  0xc1   :  { %550 = vmatpush.msra.mxu3 %v517_v9 }
  0xc2   :  { %378 = vrot.lane.b32.xlu2 %v245_v11, %s890_s20  ;;  %418 = vrot.lane.b32.xlu0 %v364_v8, %s890_s20  ;;  %v459_v8 = vld [vmem:[%s1382_s8 + $0x28] sm:$0xff]  ;;  %v457_v11 = vld [vmem:[%s1382_s8 + $0x18] sm:$0xff] }
  0xc3   :  { %493 = vmatpush.msra.mxu2 %v459_v8  ;;  %v570_v8 = vld [vmem:[%s1386_s0 + $0x8] sm:$0xff] }
  0xc4   :  { %v1211_v9 = vmul.f32 %v574_v7, %v570_v8 }
  0xc5   :  { %v225_v13 = vpop.f32.mrf.mxu0  ;;  %v345_v14 = vpop.f32.mrf.mxu1  ;;  %494 = vmatpush.msra.mxu2 %v458_v10  ;;  %v575_v10 = vld [vmem:[%s1385_s1 + $0x10] sm:$0xff] }
  0xc6   :  { %v346_v16 = vadd.f32 %v1052_v4, %v345_v14  ;;  %v226_v31 = vadd.f32 %v1046_v0, %v225_v13  ;;  %v455_v13 = vld [vmem:[%s1382_s8 + $0x8] sm:$0xff]  ;;  %v454_v14 = vld [vmem:[%s1382_s8] sm:$0xff] }
  0xc7   :  { %495 = vmatpush.msra.mxu2 %v457_v11  ;;  %v571_v11 = vld [vmem:[%s1386_s0 + $0x10] sm:$0xff] }
  0xc8   :  { %v366_v18 = vmax.f32 %v346_v16, 0.0  ;;  %v246_v37 = vmax.f32 %v226_v31, 0.0  ;;  %v515_v16 = vld [vmem:[%s1383_s10 + $0x18] sm:$0xff] }
  0xc9   :  { %496 = vmatpush.msra.mxu2 %v456_v12  ;;  %v1219_v12 = vmul.f32 %v575_v10, %v571_v11 }
  0xca   :  { %420 = vrot.lane.b32.xlu2 %v365_v15, %s890_s20  ;;  %v516_v15 = vld [vmem:[%s1383_s10 + $0x20] sm:$0xff] }
  0xcb   :  { %497 = vmatpush.msra.mxu2 %v455_v13  ;;  %551 = vmatpush.msra.mxu3 %v516_v15  ;;  %v885_v13 = vld [vmem:[%s1381_s9] ss:$0 sm:$0xff]  ;;  %s892_s9 = smov 96  }
  0xcd   :  { %v227_v17 = vpop.f32.mrf.mxu0  ;;  %v347_v19 = vpop.f32.mrf.mxu1  ;;  %498 = vmatpush.msra.mxu2 %v454_v14  ;;  %552 = vmatpush.msra.mxu3 %v515_v16 }
  0xce   :  { %v348_v39 = vadd.f32 %v1052_v4, %v347_v19  ;;  %v228_v47 = vadd.f32 %v1046_v0, %v227_v17  ;;  %v514_v17 = vld [vmem:[%s1383_s10 + $0x10] sm:$0xff]  ;;  %v512_v19 = vld [vmem:[%s1383_s10] sm:$0xff] }
  0xcf   :  { %553 = vmatpush.msra.mxu3 %v514_v17  ;;  %v572_v17 = vld [vmem:[%s1386_s0 + $0x18] sm:$0xff] }
  0xd0   :  { %v367_v44 = vmax.f32 %v348_v39, 0.0  ;;  %v247_v49 = vmax.f32 %v228_v47, 0.0  ;;  %v338_v47 = vadd.f32 %v1052_v4, %v1041_v63 }
  0xd2   :  { %422 = vrot.lane.b32.xlu2 %v366_v18, %s890_s20  ;;  %v513_v18 = vld [vmem:[%s1383_s10 + $0x8] sm:$0xff]  ;;  %v363_v53 = vmax.f32 %v338_v47, 0.0  ;;  %v663_v47 = vld [vmem:[%s1388_s12 + $0x50] sm:$0xff] }
  0xd3   :  { %554 = vmatpush.msra.mxu3 %v513_v18  ;;  %v576_v18 = vld [vmem:[%s1385_s1 + $0x18] sm:$0xff] }
  0xd5   :  { %v230_v20 = vpop.f32.mrf.mxu0  ;;  %v350_v22 = vpop.f32.mrf.mxu1  ;;  %555 = vmatpush.msra.mxu3 %v512_v19  ;;  %v1230_v19 = vmul.f32 %v576_v18, %v572_v17 }
  0xd6   :  { %v231_v21 = vadd.f32 %v1046_v0, %v230_v20  ;;  %v351_v24 = vadd.f32 %v1052_v4, %v350_v22 }
  0xd8   :  { %v248_v23 = vmax.f32 %v231_v21, 0.0  ;;  %v368_v26 = vmax.f32 %v351_v24, 0.0  ;;  %v211_v21 = vadd.f32 %v1046_v0, %v1027_v56 }
  0xda   :  { %392 = vrot.lane.b32.xlu1 %v248_v23, %s891_s6  ;;  %v240_v23 = vmax.f32 %v211_v21, 0.0 }
  0xdd   :  { %v232_v25 = vpop.f32.mrf.mxu0  ;;  %v352_v27 = vpop.f32.mrf.mxu1 }
  0xde   :  { %v353_v28 = vadd.f32 %v1052_v4, %v352_v27  ;;  %v233_v30 = vadd.f32 %v1046_v0, %v232_v25 }
  0xe0   :  { %v369_v29 = vmax.f32 %v353_v28, 0.0  ;;  %v249_v35 = vmax.f32 %v233_v30, 0.0  ;;  %v331_v28 = vadd.f32 %v1052_v4, %v1029_v57 }
  0xe2   :  { %434 = vrot.lane.b32.xlu1 %v368_v26, %s891_s6  ;;  %436 = vrot.lane.b32.xlu0 %v369_v29, %s891_s6  ;;  %v360_v30 = vmax.f32 %v331_v28, 0.0 }
  0xe5   :  { %v235_v32 = vpop.f32.mrf.mxu0  ;;  %v355_v33 = vpop.f32.mrf.mxu1 }
  0xe6   :  { %v236_v34 = vadd.f32 %v1046_v0, %v235_v32  ;;  %v356_v38 = vadd.f32 %v1052_v4, %v355_v33 }
  0xe8   :  { %v250_v36 = vmax.f32 %v236_v34, 0.0  ;;  %v370_v40 = vmax.f32 %v356_v38, 0.0  ;;  %v213_v34 = vadd.f32 %v1046_v0, %v1031_v58  ;;  %v216_v38 = vadd.f32 %v1046_v0, %v1035_v60 }
  0xea   :  { %394 = vrot.lane.b32.xlu1 %v249_v35, %s891_s6  ;;  %396 = vrot.lane.b32.xlu2 %v250_v36, %s891_s6  ;;  %v333_v35 = vadd.f32 %v1052_v4, %v1033_v59  ;;  %v241_v36 = vmax.f32 %v213_v34, 0.0  ;;  %v336_v59 = vadd.f32 %v1052_v4, %v1037_v61 }
  0xeb   :  { %380 = vrot.lane.b32.xlu0 %v246_v37, %s890_s20 }
  0xec   :  { %v361_v57 = vmax.f32 %v333_v35, 0.0 }
  0xed   :  { %v357_v41 = vpop.f32.mrf.mxu1  ;;  %v237_v43 = vpop.f32.mrf.mxu0 }
  0xee   :  { %v358_v42 = vadd.f32 %v1052_v4, %v357_v41  ;;  %v238_v46 = vadd.f32 %v1046_v0, %v237_v43  ;;  %v569_v0 = vld [vmem:[%s1386_s0] sm:$0xff] }
  0xef   :  { %v1203_v6 = vmul.f32 %v573_v62, %v569_v0 }
  0xf0   :  { %v371_v45 = vmax.f32 %v358_v42, 0.0  ;;  %v251_v48 = vmax.f32 %v238_v46, 0.0 }
  0xf2   :  { %438 = vrot.lane.b32.xlu1 %v370_v40, %s891_s6  ;;  %440 = vrot.lane.b32.xlu2 %v371_v45, %s891_s6  ;;  %v362_v45 = vmax.f32 %v336_v59, 0.0  ;;  %v668_v59 = vld [vmem:[%s1388_s12 + $0x78] sm:$0xff] }
  0xf3   :  { %424 = vrot.lane.b32.xlu0 %v367_v44, %s890_s20  ;;  %v242_v44 = vmax.f32 %v216_v38, 0.0  ;;  %673 = vmatpush.msrb.mxu2 %v668_v59 }
  0xf4   :  { %859 = vmatpush.msrb.mxu3 %v668_v59 }
  0xfa   :  { %382 = vrot.lane.b32.xlu1 %v247_v49, %s890_s20 }
  0xfb   :  { %398 = vrot.lane.b32.xlu0 %v251_v48, %s891_s6 }
 0x11c   :  { %v379_v22 = vpop.permute.xlu2 %378 }
 0x11d   :  { %v406_v39 = vsel %vm404_vm4, %v241_v36, %v379_v22 }
 0x124   :  { %v421_v29 = vpop.permute.xlu2 %420 }
 0x125   :  { %v447_v40 = vsel %vm404_vm4, %v361_v57, %v421_v29 }
 0x12c   :  { %v377_v20 = vpop.permute.xlu0 %376  ;;  %v423_v37 = vpop.permute.xlu2 %422 }
 0x12d   :  { %v405_v24 = vsel %vm404_vm4, %v240_v23, %v377_v20  ;;  %v448_v48 = vsel %vm404_vm4, %v362_v45, %v423_v37  ;;  %v886_v20 = vld [vmem:[%s1384_s11] ss:$0 sm:$0xff]  ;;  %v666_v45 = vld [vmem:[%s1388_s12 + $0x68] sm:$0xff] }
 0x134   :  { %v419_v26 = vpop.permute.xlu0 %418 }
 0x135   :  { %v446_v56 = vsel %vm404_vm4, %v360_v30, %v419_v26 }
 0x144   :  { %v397_v60 = vpop.permute.xlu2 %396 }
 0x14c   :  { %v393_v25 = vpop.permute.xlu1 %392  ;;  %v441_v63 = vpop.permute.xlu2 %440 }
 0x14d   :  { %v410_v27 = vsel %vm409_vm3, %v405_v24, %v393_v25 }
 0x14e   :  { %841 = vmatmul.msk.f32.vlgmr.msra.gmra.mxu2 %vm470_vm5, %v410_v27 }
 0x154   :  { %v435_v31 = vpop.permute.xlu1 %434  ;;  %v437_v33 = vpop.permute.xlu0 %436 }
 0x155   :  { %v450_v32 = vsel %vm409_vm3, %v446_v56, %v435_v31  ;;  %v451_v42 = vsel %vm409_vm3, %v447_v40, %v437_v33 }
 0x156   :  { %845 = vmatmul.msk.f32.vlgmr.msra.gmra.mxu3 %vm470_vm5, %v450_v32 }
 0x15c   :  { %v395_v41 = vpop.permute.xlu1 %394 }
 0x15d   :  { %v381_v43 = vpop.permute.xlu0 %380  ;;  %v411_v58 = vsel %vm409_vm3, %v406_v39, %v395_v41 }
 0x15e   :  { %846 = vmatmul.msk.f32.gmra.mxu3 %vm470_vm5, %v451_v42  ;;  %842 = vmatmul.msk.f32.gmra.mxu2 %vm470_vm5, %v411_v58  ;;  %v407_v46 = vsel %vm404_vm4, %v242_v44, %v381_v43  ;;  %v667_v44 = vld [vmem:[%s1388_s12 + $0x70] sm:$0xff] }
 0x15f   :  { %v412_v61 = vsel %vm409_vm3, %v407_v46, %v397_v60  ;;  %674 = vmatpush.msrb.mxu2 %v667_v44  ;;  %860 = vmatpush.msrb.mxu3 %v667_v44  ;;  %v665_v60 = vld [vmem:[%s1388_s12 + $0x60] sm:$0xff]  ;;  %v664_v46 = vld [vmem:[%s1388_s12 + $0x58] sm:$0xff] }
 0x160   :  { %v763_v44 = vld [vmem:[%s1391_s16] sm:$0xff] }
 0x161   :  { %675 = vmatpush.msrb.mxu2 %v666_v45  ;;  %861 = vmatpush.msrb.mxu3 %v666_v45  ;;  %v888_v45 = vld [vmem:[%s1390_s15] ss:$0 sm:$0xff] }
 0x163   :  { %676 = vmatpush.msrb.mxu2 %v665_v60  ;;  %862 = vmatpush.msrb.mxu3 %v665_v60  ;;  %v23_v60 = vstv %s1392_s17 }
 0x164   :  { %v439_v49 = vpop.permute.xlu1 %438  ;;  %24 = vst [vmem:[#allocation2] sm:$0x1] %v23_v60 }
 0x165   :  { %v452_v50 = vsel %vm409_vm3, %v448_v48, %v439_v49  ;;  %v425_v51 = vpop.permute.xlu0 %424  ;;  %677 = vmatpush.msrb.mxu2 %v664_v46  ;;  %863 = vmatpush.msrb.mxu3 %v664_v46  ;;  %v662_v48 = vld [vmem:[%s1388_s12 + $0x48] sm:$0xff]  ;;  %v661_v49 = vld [vmem:[%s1388_s12 + $0x40] sm:$0xff] }
 0x166   :  { %847 = vmatmul.msk.f32.gmra.mxu3 %vm470_vm5, %v452_v50  ;;  %843 = vmatmul.msk.f32.gmra.mxu2 %vm470_vm5, %v412_v61  ;;  %v449_v54 = vsel %vm404_vm4, %v363_v53, %v425_v51  ;;  %v660_v50 = vld [vmem:[%s1388_s12 + $0x38] sm:$0xff]  ;;  %v659_v51 = vld [vmem:[%s1388_s12 + $0x30] sm:$0xff]  ;;  %v658_v61 = vld [vmem:[%s1388_s12 + $0x28] sm:$0xff] }
 0x167   :  { %v453_v2 = vsel %vm409_vm3, %v449_v54, %v441_v63  ;;  %678 = vmatpush.msrb.mxu2 %v663_v47  ;;  %864 = vmatpush.msrb.mxu3 %v663_v47  ;;  %v656_v53 = vld [vmem:[%s1388_s12 + $0x18] sm:$0xff]  ;;  %v655_v54 = vld [vmem:[%s1388_s12 + $0x10] sm:$0xff]  ;;  %v653_v63 = vld [vmem:[%s1388_s12] sm:$0xff] }
 0x169   :  { %679 = vmatpush.msrb.mxu2 %v662_v48  ;;  %865 = vmatpush.msrb.mxu3 %v662_v48 }
 0x16b   :  { %680 = vmatpush.msrb.mxu2 %v661_v49  ;;  %866 = vmatpush.msrb.mxu3 %v661_v49 }
 0x16c   :  { %v383_v4 = vpop.permute.xlu1 %382 }
 0x16d   :  { %v408_v1 = vsel %vm404_vm4, %v243_v55, %v383_v4  ;;  %v399_v3 = vpop.permute.xlu0 %398  ;;  %681 = vmatpush.msrb.mxu2 %v660_v50  ;;  %867 = vmatpush.msrb.mxu3 %v660_v50  ;;  %v654_v55 = vld [vmem:[%s1388_s12 + $0x8] sm:$0xff]  ;;  %v713_v4 = vld [vmem:[%s1389_s14 + $0x38] sm:$0xff] }
 0x16e   :  { %848 = vmatmul.msk.f32.gmra.mxu3 %vm470_vm5, %v453_v2  ;;  %v413_v5 = vsel %vm409_vm3, %v408_v1, %v399_v3  ;;  %v712_v1 = vld [vmem:[%s1389_s14 + $0x30] sm:$0xff]  ;;  %v711_v2 = vld [vmem:[%s1389_s14 + $0x28] sm:$0xff] }
 0x16f   :  { %844 = vmatmul.msk.f32.gmra.mxu2 %vm470_vm5, %v413_v5  ;;  %868 = vmatpush.msrb.mxu3 %v659_v51  ;;  %v710_v5 = vld [vmem:[%s1389_s14 + $0x20] sm:$0xff] }
 0x170   :  { %682 = vmatpush.msrb.mxu2 %v659_v51 }
 0x171   :  { %869 = vmatpush.msrb.mxu3 %v658_v61 }
 0x172   :  { %683 = vmatpush.msrb.mxu2 %v658_v61 }
 0x173   :  { %870 = vmatpush.msrb.mxu3 %v657_v52 }
 0x174   :  { %684 = vmatpush.msrb.mxu2 %v657_v52 }
 0x175   :  { %871 = vmatpush.msrb.mxu3 %v656_v53 }
 0x176   :  { %685 = vmatpush.msrb.mxu2 %v656_v53 }
 0x177   :  { %872 = vmatpush.msrb.mxu3 %v655_v54 }
 0x178   :  { %686 = vmatpush.msrb.mxu2 %v655_v54 }
 0x179   :  { %873 = vmatpush.msrb.mxu3 %v654_v55 }
 0x17a   :  { %687 = vmatpush.msrb.mxu2 %v654_v55 }
 0x17b   :  { %874 = vmatpush.msrb.mxu3 %v653_v63 }
 0x17c   :  { %688 = vmatpush.msrb.mxu2 %v653_v63 }
 0x17d   :  { %738 = vmatpush.msra.mxu3 %v713_v4  ;;  %v889_v4 = vld [vmem:[#allocation2] ss:$0 sm:$0xff] }
 0x17f   :  { %739 = vmatpush.msra.mxu3 %v712_v1 }
 0x181   :  { %740 = vmatpush.msra.mxu3 %v711_v2 }
 0x183   :  { %741 = vmatpush.msra.mxu3 %v710_v5 }
 0x1d1   :  { %v500_v14 = vpop.f32.mrf.mxu2 }
 0x1d2   :  { %v501_v15 = vadd.f32 %v885_v13, %v500_v14 }
 0x1d4   :  { %v585_v16 = vmul.f32 %v573_v62, %v501_v15 }
 0x1d6   :  { %613 = vrot.lane.b32.xlu2 %v585_v16, %s891_s6 }
 0x1d9   :  { %v557_v21 = vpop.f32.mrf.mxu3 }
 0x1da   :  { %v558_v22 = vadd.f32 %v886_v20, %v557_v21 }
 0x1dc   :  { %v589_v23 = vmul.f32 %v558_v22, %v501_v15  ;;  %v581_v28 = vmul.f32 %v569_v0, %v558_v22 }
 0x1de   :  { %629 = vrot.lane.b32.xlu0 %v589_v23, %s892_s9 }
 0x1e1   :  { %v503_v24 = vpop.f32.mrf.mxu2  ;;  %v560_v25 = vpop.f32.mrf.mxu3 }
 0x1e2   :  { %v504_v26 = vadd.f32 %v885_v13, %v503_v24  ;;  %v561_v27 = vadd.f32 %v886_v20, %v560_v25 }
 0x1e4   :  { %v582_v29 = vmul.f32 %v570_v8, %v561_v27  ;;  %v590_v30 = vmul.f32 %v561_v27, %v504_v26  ;;  %v586_v57 = vmul.f32 %v574_v7, %v504_v26  ;;  %v709_v7 = vld [vmem:[%s1389_s14 + $0x18] sm:$0xff] }
 0x1e5   :  { %742 = vmatpush.msra.mxu3 %v709_v7 }
 0x1e6   :  { %631 = vrot.lane.b32.xlu2 %v590_v30, %s892_s9  ;;  %v878_v56 = vpack.i.bf16 %v582_v29, %v581_v28 }
 0x1e8   :  { %879 = vrot.lane.b32.xlu1 %v878_v56, %s890_s20 }
 0x1e9   :  { %v506_v31 = vpop.f32.mrf.mxu2  ;;  %v563_v32 = vpop.f32.mrf.mxu3 }
 0x1ea   :  { %v507_v33 = vadd.f32 %v885_v13, %v506_v31  ;;  %v564_v34 = vadd.f32 %v886_v20, %v563_v32  ;;  %v706_v31 = vld [vmem:[%s1389_s14] sm:$0xff]  ;;  %v766_v32 = vld [vmem:[%s1391_s16 + $0x18] sm:$0xff] }
 0x1eb   :  { %795 = vmatpush.msra.mxu2 %v766_v32 }
 0x1ec   :  { %v583_v35 = vmul.f32 %v571_v11, %v564_v34  ;;  %v591_v36 = vmul.f32 %v564_v34, %v507_v33  ;;  %v587_v43 = vmul.f32 %v575_v10, %v507_v33  ;;  %v708_v11 = vld [vmem:[%s1389_s14 + $0x10] sm:$0xff]  ;;  %v764_v34 = vld [vmem:[%s1391_s16 + $0x8] sm:$0xff] }
 0x1ed   :  { %743 = vmatpush.msra.mxu3 %v708_v11  ;;  %v765_v33 = vld [vmem:[%s1391_s16 + $0x10] sm:$0xff] }
 0x1ee   :  { %633 = vrot.lane.b32.xlu2 %v591_v36, %s892_s9  ;;  %601 = vrot.lane.b32.xlu0 %v583_v35, %s890_s20 }
 0x1ef   :  { %796 = vmatpush.msra.mxu2 %v765_v33 }
 0x1f0   :  { %615 = vrot.lane.b32.xlu1 %v586_v57, %s891_s6 }
 0x1f1   :  { %v566_v37 = vpop.f32.mrf.mxu3  ;;  %797 = vmatpush.msra.mxu2 %v764_v34 }
 0x1f2   :  { %v567_v38 = vadd.f32 %v886_v20, %v566_v37  ;;  %v509_v39 = vpop.f32.mrf.mxu2 }
 0x1f3   :  { %v510_v40 = vadd.f32 %v885_v13, %v509_v39  ;;  %798 = vmatpush.msra.mxu2 %v763_v44 }
 0x1f4   :  { %v584_v41 = vmul.f32 %v572_v17, %v567_v38 }
 0x1f5   :  { %v592_v42 = vmul.f32 %v567_v38, %v510_v40  ;;  %v588_v58 = vmul.f32 %v576_v18, %v510_v40 }
 0x1f6   :  { %603 = vrot.lane.b32.xlu0 %v584_v41, %s890_s20 }
 0x1f7   :  { %635 = vrot.lane.b32.xlu2 %v592_v42, %s892_s9  ;;  %s1403_s9 = sld [smem:[#allocation6_spill]] }
 0x1f8   :  { %617 = vrot.lane.b32.xlu1 %v587_v43, %s891_s6 }
 0x200   :  { %619 = vrot.lane.b32.xlu1 %v588_v58, %s891_s6 }
 0x230   :  { %v614_v3 = vpop.permute.xlu2 %613 }
 0x240   :  { %v632_v16 = vpop.permute.xlu2 %631 }
 0x248   :  { %v634_v24 = vpop.permute.xlu2 %633 }
 0x250   :  { %v630_v8 = vpop.permute.xlu0 %629 }
 0x251   :  { %v636_v29 = vpop.permute.xlu2 %635 }
 0x25a   :  { %v880_v62 = vpop.permute.xlu1 %879 }
 0x25b   :  { %v881_v0 = vunpack.i.l.bf16 %v880_v62  ;;  %v882_v14 = vunpack.i.h.bf16 %v880_v62 }
 0x25d   :  { %v641_v10 = vsel %vm404_vm4, %v1203_v6, %v881_v0  ;;  %v642_v18 = vsel %vm404_vm4, %v1211_v9, %v882_v14 }
 0x25e   :  { %v645_v13 = vsel %vm409_vm3, %v641_v10, %v614_v3 }
 0x25f   :  { %v649_v15 = vsel %vm470_vm5, %v645_v13, %v630_v8 }
 0x260   :  { %689 = vmatmul.f32.vlgmr.msrb.gmra.mxu2 %v649_v15  ;;  %v602_v6 = vpop.permute.xlu0 %601 }
 0x261   :  { %v643_v22 = vsel %vm404_vm4, %v1219_v12, %v602_v6  ;;  %v707_v12 = vld [vmem:[%s1389_s14 + $0x8] sm:$0xff] }
 0x262   :  { %v616_v17 = vpop.permute.xlu1 %615  ;;  %744 = vmatpush.msra.mxu3 %v707_v12 }
 0x263   :  { %v646_v20 = vsel %vm409_vm3, %v642_v18, %v616_v17 }
 0x264   :  { %v650_v21 = vsel %vm470_vm5, %v646_v20, %v632_v16  ;;  %745 = vmatpush.msra.mxu3 %v706_v31 }
 0x268   :  { %692 = vmatmul.f32.gmra.mxu2 %v650_v21  ;;  %v604_v27 = vpop.permute.xlu0 %603 }
 0x269   :  { %v644_v9 = vsel %vm404_vm4, %v1230_v19, %v604_v27  ;;  %v887_v19 = vld [vmem:[%s1403_s9] ss:$0 sm:$0xff] }
 0x26a   :  { %v618_v23 = vpop.permute.xlu1 %617 }
 0x26b   :  { %v647_v25 = vsel %vm409_vm3, %v643_v22, %v618_v23 }
 0x26c   :  { %v651_v26 = vsel %vm470_vm5, %v647_v25, %v634_v24 }
 0x26d   :  { %695 = vmatmul.f32.vlgmr.msrb.gmra.mxu3 %v651_v26 }
 0x272   :  { %v620_v28 = vpop.permute.xlu1 %619 }
 0x273   :  { %v648_v30 = vsel %vm409_vm3, %v644_v9, %v620_v28 }
 0x274   :  { %v652_v56 = vsel %vm470_vm5, %v648_v30, %v636_v29 }
 0x275   :  { %698 = vmatmul.f32.gmra.mxu3 %v652_v56 }
 0x2e3   :  { %v690_v35 = vpop.f32.mrf.mxu2 }
 0x2e4   :  { %v691_v36 = vadd.f32 %v887_v19, %v690_v35 }
 0x2e6   :  { %v702_v57 = vmax.f32 %v691_v36, 0.0 }
 0x2e8   :  { %849 = vmatmul.msk.f32.vlgmr.msra.gmra.mxu3 %vm409_vm3, %v702_v57 }
 0x2eb   :  { %v693_v37 = vpop.f32.mrf.mxu2 }
 0x2ec   :  { %v694_v38 = vadd.f32 %v887_v19, %v693_v37 }
 0x2ee   :  { %v703_v39 = vmax.f32 %v694_v38, 0.0 }
 0x2f0   :  { %v696_v40 = vpop.f32.mrf.mxu3  ;;  %850 = vmatmul.msk.f32.gmra.mxu3 %vm409_vm3, %v703_v39 }
 0x2f1   :  { %v697_v41 = vadd.f32 %v887_v19, %v696_v40 }
 0x2f3   :  { %v704_v42 = vmax.f32 %v697_v41, 0.0 }
 0x2f8   :  { %v699_v43 = vpop.f32.mrf.mxu3  ;;  %851 = vmatmul.msk.f32.gmra.mxu3 %vm409_vm3, %v704_v42 }
 0x2f9   :  { %v700_v58 = vadd.f32 %v887_v19, %v699_v43 }
 0x2fb   :  { %v705_v59 = vmax.f32 %v700_v58, 0.0 }
 0x300   :  { %852 = vmatmul.msk.f32.gmra.mxu3 %vm409_vm3, %v705_v59 }
 0x36b   :  { %v747_v46 = vpop.f32.mrf.mxu3 }
 0x36c   :  { %v748_v47 = vadd.f32 %v888_v45, %v747_v46 }
 0x36e   :  { %v759_v48 = vmax.f32 %v748_v47, 0.0 }
 0x370   :  { %853 = vmatmul.msk.f32.vlgmr.msra.gmra.mxu2 %vm404_vm4, %v759_v48 }
 0x373   :  { %v750_v49 = vpop.f32.mrf.mxu3 }
 0x374   :  { %v751_v50 = vadd.f32 %v888_v45, %v750_v49 }
 0x376   :  { %v760_v51 = vmax.f32 %v751_v50, 0.0 }
 0x378   :  { %854 = vmatmul.msk.f32.gmra.mxu2 %vm404_vm4, %v760_v51 }
 0x37b   :  { %v753_v61 = vpop.f32.mrf.mxu3 }
 0x37c   :  { %v754_v52 = vadd.f32 %v888_v45, %v753_v61 }
 0x37e   :  { %v761_v53 = vmax.f32 %v754_v52, 0.0 }
 0x380   :  { %855 = vmatmul.msk.f32.gmra.mxu2 %vm404_vm4, %v761_v53 }
 0x383   :  { %v756_v54 = vpop.f32.mrf.mxu3 }
 0x384   :  { %v757_v55 = vadd.f32 %v888_v45, %v756_v54 }
 0x386   :  { %v762_v63 = vmax.f32 %v757_v55, 0.0 }
 0x388   :  { %856 = vmatmul.msk.f32.gmra.mxu2 %vm404_vm4, %v762_v63 }
 0x3f3   :  { %v800_v1 = vpop.f32.mrf.mxu2 }
 0x3f4   :  { %v801_v2 = vadd.f32 %v889_v4, %v800_v1 }
 0x3f6   :  { %813 = vst.msk [vmem:[%s1393_s18] sm:$0xff] %vm812_vm6, %v801_v2 }
 0x3fb   :  { %v803_v3 = vpop.f32.mrf.mxu2 }
 0x3fc   :  { %v804_v5 = vadd.f32 %v889_v4, %v803_v3 }
 0x3fe   :  { %814 = vst.msk [vmem:[%s1393_s18 + $0x8] sm:$0xff] %vm812_vm6, %v804_v5 }
 0x403   :  { %v806_v62 = vpop.f32.mrf.mxu2 }
 0x404   :  { %v807_v0 = vadd.f32 %v889_v4, %v806_v62 }
 0x406   :  { %815 = vst.msk [vmem:[%s1393_s18 + $0x10] sm:$0xff] %vm812_vm6, %v807_v0 }
 0x40b   :  { %v809_v7 = vpop.f32.mrf.mxu2 }
 0x40c   :  { %v810_v8 = vadd.f32 %v889_v4, %v809_v7 }
 0x40e   :  { %816 = vst.msk [vmem:[%s1393_s18 + $0x18] sm:$0xff] %vm812_vm6, %v810_v8 }

</bundles_post_ra>
